<compile_context>
chip_gen: v7x
topology: tpu7x:2x2x1
jax: 0.10.0
libtpu: 0.0.40
codegen_flags: <defaults>
</compile_context>

<pallas_src>
import math

import jax
import jax.numpy as jnp
from jax.experimental import pallas as pl
from jax.experimental.pallas import tpu as pltpu


# --------------------------------------------------------------------------- #
# Kernels
# --------------------------------------------------------------------------- #
def _glu_pair_kernel(a_ref, g_ref, o_ref):
    """o = a * sigmoid(g); two refs hold the two halves of the split dim."""
    a = a_ref[...].astype(jnp.float32)
    g = g_ref[...].astype(jnp.float32)
    o_ref[...] = (a * jax.nn.sigmoid(g)).astype(o_ref.dtype)


def _glu_fused_kernel(x_ref, o_ref):
    """x_ref holds (rows, 2C); split on the lane axis inside the kernel
    (single input DMA per grid step)."""
    c = o_ref.shape[-1]
    a = x_ref[:, :c].astype(jnp.float32)
    g = x_ref[:, c:].astype(jnp.float32)
    o_ref[...] = (a * jax.nn.sigmoid(g)).astype(o_ref.dtype)


# --------------------------------------------------------------------------- #
# Tiling helpers
# --------------------------------------------------------------------------- #
def _largest_divisor(full, cap):
    """Largest divisor of `full` that is <= cap (>= 1)."""
    cap = max(1, min(full, cap))
    best, i = 1, 1
    while i * i <= full:
        if full % i == 0:
            lo, hi = i, full // i
            if lo <= cap and lo > best:
                best = lo
            if hi <= cap and hi > best:
                best = hi
        i += 1
    return best


def _pick_tile(full, unit, cap):
    """Largest divisor of `full` that is a multiple of `unit` and <= cap.
    If `full` is not a multiple of `unit`, return the full extent (a
    full-extent block dim is always legal)."""
    if full % unit != 0:
        return full
    cap = max(unit, min(full, cap))
    return _largest_divisor(full // unit, cap // unit) * unit


def _sublane_unit(dtype):
    """Sub-32-bit dtypes pack along sublanes: 8 f32, 16 bf16, 32 int8/fp8."""
    return max(8, 32 // jnp.dtype(dtype).itemsize)


def _hw_budgets():
    """(per-block byte target, vmem_limit_bytes) per TPU generation.
    3 block buffers x 2 (double-buffer) x block_bytes must stay inside the
    scoped-VMEM limit we request."""
    try:
        kind = jax.devices()[0].device_kind.lower()
    except Exception:
        kind = ""
    if "v7" in kind or "7x" in kind:
        # 64 MiB physical VMEM, ~3.2 TB/s HBM: 4 MiB blocks -> 24 MiB buffered.
        return 4 << 20, 32 << 20
    if "v6" in kind:
        # 128 MiB physical VMEM: >=2 MiB blocks already ~85% of roofline.
        return 6 << 20, 64 << 20
    if "v5 lite" in kind or "v5e" in kind or "v5lite" in kind:
        # 128 MiB physical but only 16 MiB scoped default -> raise it explicitly.
        return 4 << 20, 48 << 20
    # Unknown generation: stay inside every default scoped-VMEM limit.
    return 2 << 20, None


# --------------------------------------------------------------------------- #
# Wrapper
# --------------------------------------------------------------------------- #
def glu(x, dim):
    """Pallas GLU: out, gate = x.chunk(2, dim); return out * sigmoid(gate)."""
    dim = dim % x.ndim
    shape = x.shape
    two_c = shape[dim]
    assert two_c % 2 == 0, "GLU split dim must be even"
    C = two_c // 2
    L = int(math.prod(shape[:dim]))
    T = int(math.prod(shape[dim + 1:]))

    itemsize = jnp.dtype(x.dtype).itemsize
    sub = _sublane_unit(x.dtype)
    block_bytes, vmem_limit = _hw_budgets()
    budget = max(128, block_bytes // itemsize)          # elements per block

    cost = pl.CostEstimate(
        flops=L * C * T,                                # one multiply / output elem
        transcendentals=L * C * T,                      # one sigmoid  / output elem
        bytes_accessed=3 * L * C * T * itemsize,        # read both halves + write out
    )

    def _call(kernel, grid, in_specs, out_specs, out_shape, semantics, *ops):
        return pl.pallas_call(
            kernel,
            out_shape=out_shape,
            grid_spec=pltpu.PrefetchScalarGridSpec(
                num_scalar_prefetch=0, grid=grid,
                in_specs=in_specs, out_specs=out_specs),
            compiler_params=pltpu.CompilerParams(
                dimension_semantics=semantics,
                vmem_limit_bytes=vmem_limit),
            cost_estimate=cost,
        )(*ops)

    out_full_shape = shape[:dim] + (C,) + shape[dim + 1:]

    # ---------------------------------------------------------------------- #
    # Lane-major layout: split dim is the last axis (T == 1).  View x as
    # (rows, 2C) so both halves live on the lane axis -> lane-dense stores.
    # ---------------------------------------------------------------------- #
    if T == 1:
        rows = L
        x2 = x.reshape(rows, two_c)                     # metadata-only view

        if C % 128 == 0:
            # Offset-BlockSpec chunking: gate half is C // ts lane-blocks away.
            ts = _pick_tile(C, 128, budget)
            tl = _pick_tile(rows, sub, max(sub, budget // ts))
            # keep >= 2 parallel blocks for v7x megacore when the grid collapses
            if rows // tl == 1 and C // ts == 1 and rows % sub == 0 and tl > sub:
                tl = _pick_tile(rows, sub, tl // 2)
            gate_off = C // ts
            out2 = _call(
                _glu_pair_kernel,
                (rows // tl, C // ts),
                [pl.BlockSpec((tl, ts), lambda r, ci: (r, ci)),
                 pl.BlockSpec((tl, ts), lambda r, ci: (r, ci + gate_off))],
                pl.BlockSpec((tl, ts), lambda r, ci: (r, ci)),
                jax.ShapeDtypeStruct((rows, C), x.dtype),
                ("parallel", "parallel"),
                x2, x2)
        else:
            # C not lane-aligned: read one (tl, 2C) row block and split on the
            # lane axis inside the kernel (full lane extent is always legal).
            tl = _pick_tile(rows, sub, max(sub, budget // max(1, two_c)))
            if rows // tl == 1 and rows % sub == 0 and tl > sub:
                tl = _pick_tile(rows, sub, tl // 2)
            out2 = _call(
                _glu_fused_kernel,
                (rows // tl,),
                [pl.BlockSpec((tl, two_c), lambda r: (r, 0))],
                pl.BlockSpec((tl, C), lambda r: (r, 0)),
                jax.ShapeDtypeStruct((rows, C), x.dtype),
                ("parallel",),
                x2)
        return out2.reshape(out_full_shape)

    # ---------------------------------------------------------------------- #
    # General layout: metadata-only (L, 2, C, T) view; the split halves are
    # selected by the BlockSpec index_maps (no wrapper-side slicing, no extra
    # HBM traffic, legal for any C because tc falls back to the full extent).
    # ---------------------------------------------------------------------- #
    x4 = x.reshape(L, 2, C, T)

    ts = _pick_tile(T, 128, budget)                     # lane tile
    tc = _pick_tile(C, sub, max(sub, budget // ts))     # sublane (channel) tile
    tl = _largest_divisor(L, max(1, budget // (ts * tc)))
    if (L // tl) * (C // tc) * (T // ts) == 1 and tl > 1:
        tl = _largest_divisor(L, tl // 2)               # keep >= 2 blocks (megacore)

    in_block = (tl, None, tc, ts)                       # split axis squeezed (size 1)
    out3 = _call(
        _glu_pair_kernel,
        (L // tl, C // tc, T // ts),
        [pl.BlockSpec(in_block, lambda l, ci, si: (l, 0, ci, si)),
         pl.BlockSpec(in_block, lambda l, ci, si: (l, 1, ci, si))],
        pl.BlockSpec((tl, tc, ts), lambda l, ci, si: (l, ci, si)),
        jax.ShapeDtypeStruct((L, C, T), x.dtype),
        ("parallel", "parallel", "parallel"),
        x4, x4)
    return out3.reshape(out_full_shape)


# --------------------------------------------------------------------------- #
# Self-test
# --------------------------------------------------------------------------- #
def _ref_glu(x, dim):
    a, g = jnp.split(x, 2, axis=dim)
    return a * jax.nn.sigmoid(g)


if __name__ == "__main__":
    key = jax.random.PRNGKey(0)
    k1, k2, k3, k4 = jax.random.split(key, 4)

    cases = [
        # (shape, dim, dtype)  -- small shapes exercising every layout path
        ((2, 2 * 8, 32), 1, jnp.float32),     # conformer conv: general (L,2,C,T) path
        ((2, 4, 2 * 128), -1, jnp.float32),   # last-dim split, lane-aligned (offset BlockSpecs)
        ((2, 6, 2 * 24), 2, jnp.float32),     # last-dim split, non-aligned (fused lane split)
        ((2, 2 * 16, 128), 1, jnp.bfloat16),  # bf16: dtype-aware sublane unit
    ]
    keys = [k1, k2, k3, k4]

    ok = True
    for (shape, dim, dtype), kk in zip(cases, keys):
        x = jax.random.normal(kk, shape, dtype=jnp.float32).astype(dtype)
        out = jax.block_until_ready(glu(x, dim))
        ref = _ref_glu(x.astype(jnp.float32), dim).astype(dtype)
        tol = 2e-2 if dtype == jnp.bfloat16 else 1e-5
        if out.shape != ref.shape or not jnp.allclose(
                out.astype(jnp.float32), ref.astype(jnp.float32),
                atol=tol, rtol=tol):
            ok = False
            print(f"MISMATCH shape={shape} dim={dim} dtype={dtype}")

    assert ok, "kernel output mismatch vs reference"
    print("KERNEL_OK")
</pallas_src>

<mosaic_0001>
module attributes {stable_mosaic.version = 11 : i64} {
  func.func @_glu_pair_kernel(%arg0: i32, %arg1: i32, %arg2: i32, %arg3: memref<1x1x8x32xf32, #tpu.memory_space<vmem>>, %arg4: memref<1x1x8x32xf32, #tpu.memory_space<vmem>>, %arg5: memref<1x8x32xf32, #tpu.memory_space<vmem>>) attributes {dimension_semantics = [#tpu.dimension_semantics<parallel>, #tpu.dimension_semantics<parallel>, #tpu.dimension_semantics<parallel>], iteration_bounds = array<i64: 2, 1, 1>, scalar_prefetch = 0 : i64, scratch_operands = 0 : i64, tpu.core_type = #tpu.core_type<tc>, window_params = [{transform_indices = @transform_0, window_bounds = array<i64: 1, 1, 8, 32>}, {transform_indices = @transform_1, window_bounds = array<i64: 1, 1, 8, 32>}, {transform_indices = @transform_2, window_bounds = array<i64: 1, 8, 32>}]} {
    %c0 = arith.constant 0 : index
    %c0_0 = arith.constant 0 : index
    %c0_1 = arith.constant 0 : index
    %c0_2 = arith.constant 0 : index
    %0 = vector.load %arg3[%c0, %c0_0, %c0_1, %c0_2] : memref<1x1x8x32xf32, #tpu.memory_space<vmem>>, vector<1x1x8x32xf32>
    %1 = vector.shape_cast %0 : vector<1x1x8x32xf32> to vector<1x8x32xf32>
    %c0_3 = arith.constant 0 : index
    %c0_4 = arith.constant 0 : index
    %c0_5 = arith.constant 0 : index
    %c0_6 = arith.constant 0 : index
    %2 = vector.load %arg4[%c0_3, %c0_4, %c0_5, %c0_6] : memref<1x1x8x32xf32, #tpu.memory_space<vmem>>, vector<1x1x8x32xf32>
    %3 = vector.shape_cast %2 : vector<1x1x8x32xf32> to vector<1x8x32xf32>
    %4 = arith.negf %3 : vector<1x8x32xf32>
    %5 = math.exp %4 : vector<1x8x32xf32>
    %cst = arith.constant 1.000000e+00 : f32
    %6 = vector.broadcast %cst : f32 to vector<1x8x32xf32>
    %7 = arith.addf %6, %5 : vector<1x8x32xf32>
    %8 = arith.divf %6, %7 : vector<1x8x32xf32>
    %9 = arith.mulf %1, %8 : vector<1x8x32xf32>
    %c0_7 = arith.constant 0 : index
    %c0_8 = arith.constant 0 : index
    %c0_9 = arith.constant 0 : index
    %10 = vector.load %arg5[%c0_7, %c0_8, %c0_9] : memref<1x8x32xf32, #tpu.memory_space<vmem>>, vector<1x8x32xf32>
    tpu.vector_store %arg5[%c0_7, %c0_8, %c0_9], %9 {strides = array<i32>} : memref<1x8x32xf32, #tpu.memory_space<vmem>>, vector<1x8x32xf32>,
    return
  }
  func.func @transform_0(%arg0: i32, %arg1: i32, %arg2: i32) -> (i32, i32, i32, i32) {
    %c0_i32 = arith.constant 0 : i32
    %c0_i32_0 = arith.constant 0 : i32
    return %arg0, %c0_i32, %arg1, %arg2 : i32, i32, i32, i32
  }
  func.func @transform_1(%arg0: i32, %arg1: i32, %arg2: i32) -> (i32, i32, i32, i32) {
    %c1_i32 = arith.constant 1 : i32
    %c0_i32 = arith.constant 0 : i32
    return %arg0, %c1_i32, %arg1, %arg2 : i32, i32, i32, i32
  }
  func.func @transform_2(%arg0: i32, %arg1: i32, %arg2: i32) -> (i32, i32, i32) {
    %c0_i32 = arith.constant 0 : i32
    return %arg0, %arg1, %arg2 : i32, i32, i32
  }
}

</mosaic_0001>

<bundles_post_ra>
// kernel: tpu_custom_call.1
= control target key start
LH: loop header
LB: loop body
LE: loop exit
PB: predicated region body
PF: predicated region fallthrough
CT: control target
= control target key end

     0   :  { %7 = vsyncpa [#allocation3], 0  ;;  %s852_s0 = inlined_call_operand.hbm [shape: f32[2,2,8,32], index: 0, kind: input, shape index: {}]   ;;  %s853_s1 = inlined_call_operand.hbm [shape: f32[2,2,8,32], index: 1, kind: input, shape index: {}]   ;;  %s854_s2 = inlined_call_operand.hbm [shape: f32[2,8,32], index: 2, kind: output, shape index: {}]  }
   0x1   :  { %9 = vsyncpa [#allocation3 + $0x1], 0 }
   0x2   :  { %10 = vsyncpa [#allocation6], 0 }
   0x3   :  { %12 = vsyncpa [#allocation6 + $0x1], 0 }
   0x4   :  { %13 = vsyncpa [#allocation4], 0 }
   0x5   :  { %15 = vsyncpa [#allocation4 + $0x1], 0  ;;  %s633_s9 = smov 0   ;;  %s635_s10 = smov 0  }
   0x6   :  { %s637_s11 = smov 0   ;;  %s639_s12 = smov 0  }
   0x7   :  { %s641_s13 = smov 0   ;;  %s643_s14 = smov 0  }
   0x8 LB: > { %s374_s15 = sadd.s32 4294967295, %s613_s14   ;;  %s375_s16 = sadd.s32 4294967294, %s613_s14   ;;  %s613_s14 = sphi %s643_s14, %s21_s14   ;;  %s609_s13 = sphi %s641_s13, %s874_s13   ;;  %s605_s12 = sphi %s639_s12, %s873_s12   ;;  %s601_s11 = sphi %s637_s11, %s872_s11   ;;  %s597_s10 = sphi %s635_s10, %s871_s10   ;;  %s593_s9 = sphi %s633_s9, %s870_s9  }
   0x9   : > { %s40_s17 = sadd.s32 1, %s609_s13  ;;  %s51_s18 = sadd.s32 1, %s601_s11 }
   0xa   : > { %p42_p0 = scmp.ge.s32.totalorder %s40_s17, 2  ;;  %p58_p1 = scmp.ne.s32.totalorder %s601_s11, %s597_s10 }
   0xb   : > { %p59_p2 = scmp.eq.s32.totalorder %s613_s14, 0  ;;  %p64_p3 = scmp.ne.s32.totalorder %s597_s10, %s593_s9 }
   0xc   : > { %s876_s17 = smov (%p42_p0, %s40_s17), 0  ;;  %p65_p5 = scmp.eq.s32.totalorder %s374_s15, 0 }
   0xd   : > { %p674_p4 = por %p59_p2, %p58_p1  ;;  %s44_s20 = ssub.s32 %s609_s13, %s876_s17 }
   0xe   : > { %p122_p6 = scmp.eq.s32.totalorder %s374_s15, 1  ;;  %p49_p7 = scmp.eq.s32.totalorder %s44_s20, 0 }
   0xf   : > { %p680_p8 = por %p65_p5, %p64_p3  ;;  %p128_p10 = scmp.eq.s32.totalorder %s375_s16, 1 }
  0x10   : > { %p684_p9 = por %p122_p6, %p58_p1  ;;  %p412_p13 = scmp.lt.s32.totalorder %s613_s14, 2 }
  0x11   : > { %s858_s21 = scalar_select %p680_p8, 1, 0 }
  0x12   : > { %s859_s22 = scalar_select %p684_p9, 1, 0 }
  0x13   : > { %s689_s23 = scalar_select %p49_p7, %s601_s11, %s51_s18  }
  0x14   : > { %p691_p11 = por %p128_p10, %p64_p3  ;;  %s698_s25 = sand.u32 1, %s601_s11  }
  0x15   : > { %s378_s26 = sshll.u32 %s698_s25, 3  ;;  %s393_s27 = sshll.u32 %s609_s13, 8 }
  0x16   : > { %s860_s24 = scalar_select %p691_p11, 1, 0 }
  0x17   : > { %s707_s30 = scalar_lea.hbm %s852_s0, %s393_s27  ;;  %s152_s3 = scalar_lea.vmem [#allocation2], %s378_s26 }
  0x18   : > { %s162_s4 = sshll.u32 %s152_s3, 4  ;;  %p715_p0 = pnand %p412_p13, %p674_p4  ;;  %s711_s4 = int_to_ptr.vmem [resolvable:$true] %s162_s4 }
  0x19   : > { %s149_s6 = scalar_lea.sflag [#allocation3], %s698_s25  ;;  %s466_s7 = scalar_lea.hbm %s707_s30, 128 }
  0x1a   : > { %p467_p3 = scmp.ne.s32.totalorder %s707_s30, %s466_s7  ;;  %p468_p5 = pneg %p715_p0 }
  0x1b   : > { %s471_s16 = scalar_lea.hbm %s852_s0, 512  ;;  %p472_p4 = scmp.lt.u32.totalorder %s707_s30, %s852_s0 }
  0x1c   : > { %p469_p6 = pnand %p468_p5, %p467_p3  ;;  %p473_p10 = scmp.lt.u32.totalorder %s471_s16, %s466_s7 }
  0x1d   : > { %p475_p12 = scmp.lt.u32.totalorder %s466_s7, %s707_s30 }
  0x1e   : > { %p470_p7 = pneg %p469_p6  ;;  %p474_p13 = por %p473_p10, %p472_p4 }
  0x20   : > { %p476_p1 = por %p475_p12, %p474_p13 }
  0x22   : > { %p477_p2 = pnand %p476_p1, %p470_p7 }
  0x24   : > { %480 = shalt.err (!%p477_p2)
}
  0x25   : > { %s481_s20 = scalar_lea.vmem %s711_s4, 128  ;;  %s615_s28 = smov [#allocation2]  }
  0x26   : > { %p482_p3 = scmp.ne.s32.totalorder %s711_s4, %s481_s20  ;;  %s486_s29 = sshll.u32 %s615_s28, 4  ;;  %s487_s29 = int_to_ptr.vmem [resolvable:$false] %s486_s29 }
  0x27   : > { %s488_s3 = scalar_lea.vmem %s487_s29, 256  ;;  %p489_p9 = scmp.lt.s32.totalorder %s711_s4, %s487_s29 }
  0x28   : > { %p484_p6 = pnand %p482_p3, %p468_p5  ;;  %p490_p4 = scmp.lt.s32.totalorder %s488_s3, %s481_s20 }
  0x2a   : > { %p485_p11 = pneg %p484_p6  ;;  %p491_p10 = por %p490_p4, %p489_p9 }
  0x2c   : > { %p492_p12 = pnand %p491_p10, %p485_p11 }
  0x2e   : > { %495 = shalt.err (!%p492_p12)
}
  0x2f   : > { %404 = dma.hbm_to_vmem [thread:$0]  (!%p715_p0), %s707_s30, 128, %s711_s4, %s149_s6  }
  0x30   : > { %p862_p1 = scmp.lt.s32.totalorder %s613_s14, 3  ;;  %p863_p2 = scmp.ge.s32.totalorder %s613_s14, 1 }
  0x31   : > { %s303_s16 = scalar_lea.hbm %s853_s1, %s393_s27  ;;  %s173_s18 = scalar_lea.vmem [#allocation5], %s378_s26 }
  0x32   : > { %p751_p7 = pnand %p863_p2, %p862_p1  ;;  %s184_s19 = sshll.u32 %s173_s18, 4  ;;  %s185_s19 = int_to_ptr.vmem [resolvable:$true] %s184_s19 }
  0x33   : > { %s762_s20 = scalar_lea.hbm %s303_s16, 128  ;;  %s170_s30 = scalar_lea.sflag [#allocation6], %s698_s25 }
  0x34   : > { %s864_s7 = scalar_select %p751_p7, 1, 0 }
  0x35   : > { %s526_s4 = scalar_lea.hbm %s303_s16, 256  ;;  %s501_s27 = scalar_lea.hbm %s853_s1, 512 }
  0x36   : > { %p497_p9 = scmp.ne.s32.totalorder %s762_s20, %s526_s4  ;;  %p502_p3 = scmp.lt.u32.totalorder %s762_s20, %s853_s1 }
  0x37   : > { %p503_p6 = scmp.lt.u32.totalorder %s501_s27, %s526_s4  ;;  %p505_p10 = scmp.lt.u32.totalorder %s526_s4, %s762_s20 }
  0x38   : > { %p499_p11 = pnand %p497_p9, %p468_p5 }
  0x39   : > { %p504_p4 = por %p503_p6, %p502_p3 }
  0x3a   : > { %p500_p13 = pneg %p499_p11 }
  0x3b   : > { %p506_p12 = por %p505_p10, %p504_p4 }
  0x3d   : > { %p507_p1 = pnand %p506_p12, %p500_p13 }
  0x3f   : > { %510 = shalt.err (!%p507_p1)
}
  0x40   : > { %s511_s25 = scalar_lea.vmem %s185_s19, 128  ;;  %s616_s3 = smov [#allocation5]  }
  0x41   : > { %p512_p2 = scmp.ne.s32.totalorder %s185_s19, %s511_s25  ;;  %s516_s8 = sshll.u32 %s616_s3, 4  ;;  %s517_s8 = int_to_ptr.vmem [resolvable:$false] %s516_s8 }
  0x42   : > { %s518_s15 = scalar_lea.vmem %s517_s8, 256  ;;  %p519_p8 = scmp.lt.s32.totalorder %s185_s19, %s517_s8 }
  0x43   : > { %p514_p9 = pnand %p512_p2, %p468_p5  ;;  %p520_p7 = scmp.lt.s32.totalorder %s518_s15, %s511_s25 }
  0x45   : > { %p515_p11 = pneg %p514_p9  ;;  %p521_p3 = por %p520_p7, %p519_p8 }
  0x47   : > { %p522_p6 = pnand %p521_p3, %p515_p11 }
  0x49   : > { %525 = shalt.err (!%p522_p6)
}
  0x4a   : > { %407 = dma.hbm_to_vmem [thread:$0]  (!%p715_p0), %s762_s20, 128, %s185_s19, %s170_s30  }
  0x4b   : > { %p865_p13 = scmp.ne.s32.totalorder %s864_s7, 0 }
  0x4c   : > { %s786_s16 = sand.u32 (!%p865_p13), 1, %s597_s10   ;;  %p866_p5 = scmp.ne.s32.totalorder (!%p865_p13), %s858_s21, 0 }
  0x4d   : > { %193 = sbr.rel (%p865_p13) target bundleno = 130 (0x82), region = 28  ;;  %s385_s18 = sshll.u32 (!%p865_p13), %s786_s16, 3 }
  0x4e   : > { %s196_s4 = scalar_lea.sflag (!%p865_p13), [#allocation3], %s786_s16  ;;  %s199_s6 = scalar_lea.vmem (!%p865_p13), [#allocation2], %s385_s18 }
  0x54   : > { %580 = dma.done.wait (%p866_p5), %s196_s4, 128  }
  0x55   : > { %582 = vsyncadd (%p866_p5), %s196_s4, 4294967168  ;;  %s205_s5 = scalar_lea.sflag [#allocation6], %s786_s16  ;;  %s208_s19 = scalar_lea.vmem [#allocation5], %s385_s18 }
  0x56   : > { %584 = dma.done.wait (%p866_p5), %s205_s5, 128  }
  0x57   : > { %586 = vsyncadd (%p866_p5), %s205_s5, 4294967168  ;;  %v235_v0 = vld [vmem:[%s208_s19] sm:$0xff]  ;;  %v234_v4 = vld [vmem:[%s199_s6] sm:$0xff]  ;;  %s233_s7 = scalar_lea.vmem [#allocation7], %s385_s18  ;;  %s390_s30 = sshll.u32 %s605_s12, 7  ;;  %vm243_vm0 = vcmask 261120  }
  0x58   : > { %v388_v1 = vmul.f32 -1.442695, %v235_v0  ;;  %s261_s20 = sshll.u32 %s233_s7, 4  ;;  %s805_s27 = scalar_lea.hbm %s854_s2, %s390_s30  ;;  %s800_s20 = int_to_ptr.vmem [resolvable:$true] %s261_s20 }
  0x59   : > { %s246_s29 = scalar_lea.sflag [#allocation4], %s786_s16  ;;  %s527_s26 = scalar_lea.vmem %s800_s20, 128 }
  0x5a   : > { %462 = vpow2.f32 %v388_v1  ;;  %p528_p8 = scmp.ne.s32.totalorder %s800_s20, %s527_s26  ;;  %p867_p0 = scmp.ne.s32.totalorder %s859_s22, 0 }
  0x5b   : > { %s617_s12 = smov [#allocation7]  }
  0x5c   : > { %p529_p7 = pnand %p528_p8, %p867_p0  ;;  %s531_s25 = sshll.u32 %s617_s12, 4  ;;  %s532_s25 = int_to_ptr.vmem [resolvable:$false] %s531_s25 }
  0x5d   : > { %s533_s3 = scalar_lea.vmem %s532_s25, 256  ;;  %p534_p10 = scmp.lt.s32.totalorder %s800_s20, %s532_s25 }
  0x5e   : > { %p530_p4 = pneg %p529_p7  ;;  %p535_p12 = scmp.lt.s32.totalorder %s533_s3, %s527_s26 }
  0x60   : > { %p536_p1 = por %p535_p12, %p534_p10 }
  0x62   : > { %p537_p2 = pnand %p536_p1, %p530_p4 }
  0x64   : > { %v463_v2 = vpop.eup %462 }
  0x65   : > { %v239_v3 = vadd.f32 1.0, %v463_v2 }
  0x67   : > { %464 = vrcp.f32 %v239_v3 }
  0x71   : > { %v465_v5 = vpop.eup %464 }
  0x72   : > { %v242_v6 = vmul.f32 %v465_v5, %v234_v4 }
  0x74   : > { %244 = vst.msk [vmem:[%s233_s7] sm:$0xff] %vm243_vm0, %v242_v6 }
  0x75   : > { %540 = shalt.err (!%p537_p2)
}
  0x76   : > { %s541_s8 = scalar_lea.hbm %s805_s27, 128  ;;  %s545_s18 = scalar_lea.hbm %s854_s2, 256 }
  0x77   : > { %p542_p9 = scmp.ne.s32.totalorder %s805_s27, %s541_s8  ;;  %p546_p6 = scmp.lt.u32.totalorder %s805_s27, %s854_s2 }
  0x78   : > { %p547_p13 = scmp.lt.u32.totalorder %s545_s18, %s541_s8  ;;  %p549_p8 = scmp.lt.u32.totalorder %s541_s8, %s805_s27 }
  0x79   : > { %p543_p11 = pnand %p542_p9, %p867_p0 }
  0x7a   : > { %p548_p5 = por %p547_p13, %p546_p6 }
  0x7b   : > { %p544_p3 = pneg %p543_p11 }
  0x7c   : > { %p550_p7 = por %p549_p8, %p548_p5 }
  0x7e   : > { %p551_p4 = pnand %p550_p7, %p544_p3 }
  0x80   : > { %554 = shalt.err (!%p551_p4)
}
  0x81   : > { %399 = dma.vmem_to_hbm [thread:$0]  (%p867_p0), %s800_s20, 128, %s805_s27, %s246_s29  }
  0x82 PF: > { %s273_s5 = sand.u32 1, %s593_s9   ;;  %p868_p10 = scmp.ne.s32.totalorder %s860_s24, 0 }
  0x83   : > { %p869_p12 = scmp.ge.s32.totalorder %s613_s14, 2  ;;  %s274_s19 = scalar_lea.sflag [#allocation4], %s273_s5 }
  0x85   : > { %p409_p1 = pnand %p869_p12, %p868_p10 }
  0x87   : > { %588 = dma.done.wait (!%p409_p1), %s274_s19, 128  }
  0x88   : > { %590 = vsyncadd (!%p409_p1), %s274_s19, 4294967168  ;;  %s21_s14 = sadd.s32 1, %s613_s14   ;;  %s870_s9 = smov %s597_s10 }
  0x89   : > { %p18_p2 = scmp.ge.s32.totalorder %s21_s14, 4   ;;  %s871_s10 = smov %s601_s11 }
  0x8a   : > { %s872_s11 = smov %s689_s23  ;;  %s873_s12 = smov %s609_s13 }
  0x8b   : > { %s874_s13 = smov %s876_s17  ;;  %20 = sbr.rel (!%p18_p2) target bundleno = 8 (0x8), region = 86 }
  0x92   :  { %279 = vsyncpa [#allocation3], 1 }
  0x93   :  { %281 = vsyncpa [#allocation3 + $0x1], 1 }
  0x94   :  { %282 = vsyncpa [#allocation6], 1 }
  0x95   :  { %284 = vsyncpa [#allocation6 + $0x1], 1 }
  0x96   :  { %285 = vsyncpa [#allocation4], 1 }
  0x97   :  { %287 = vsyncpa [#allocation4 + $0x1], 1 }

</bundles_post_ra>
